<compile_context>
chip_gen: v7x
topology: tpu7x:2x2x1
jax: 0.10.0
libtpu: 0.0.40
codegen_flags: <defaults>
</compile_context>

<pallas_src>
import jax
import jax.numpy as jnp
from jax.experimental import pallas as pl
from jax.experimental.pallas import tpu as pltpu


def _round_up(x, m):
    return ((x + m - 1) // m) * m


def _make_kernel(alpha, act, out_dtype):
    """Kernel closure over the LeakyReLU slope and the output activation."""

    def kernel(sl_ref, sr_ref, mask_ref, h_ref, out_ref, acc_ref, rsum_ref):
        j = pl.program_id(1)

        @pl.when(j == 0)
        def _():
            acc_ref[...] = jnp.zeros_like(acc_ref)
            rsum_ref[...] = jnp.zeros_like(rsum_ref)

        # Hoisted score vectors: (tm, 1) + (1, tn) -> (tm, tn) logits tile.
        score = sl_ref[...] + sr_ref[...]
        # exp(-LeakyReLU_alpha(score)), masked by the adjacency pattern.
        lrelu = jnp.where(score >= 0.0, score, alpha * score)
        e = jnp.exp(-lrelu) * mask_ref[...].astype(jnp.float32)

        # Online row-sum and neighbor aggregation (E @ h) on the MXU.
        rsum_ref[...] += jnp.sum(e, axis=-1, keepdims=True)
        acc_ref[...] += jnp.dot(e, h_ref[...],
                                preferred_element_type=jnp.float32)

        @pl.when(j == pl.num_programs(1) - 1)
        def _():
            h_prime = acc_ref[...] / rsum_ref[...]
            out_ref[...] = act(h_prime).astype(out_dtype)

    return kernel


def sp_graph_attention(x, adj_mask, W, a, *, alpha=0.2, act=jax.nn.relu,
                       tm=256, tn=512):
    """SpGraphAttentionLayer.forward with a dense 0/1 adjacency mask.

    x:        (N, in_features) f32
    adj_mask: (N, N) 0/1 mask == sparsity pattern of the torch.sparse adj
    W:        (in_features, out_features) f32
    a:        (1, 2*out_features) f32
    act:      elementwise jnp activation (the module's `activation` arg)
    """
    N, _ = x.shape
    F_out = W.shape[1]
    assert adj_mask.shape == (N, N)
    f32 = jnp.float32
    hi = jax.lax.Precision.HIGHEST

    # --- hoisted to plain XLA (perf review item 1) ------------------------
    h = jnp.dot(x.astype(f32), W.astype(f32), precision=hi)            # (N, F)
    sl = jnp.dot(h, a[0, :F_out].astype(f32).reshape(F_out, 1),
                 precision=hi)                                          # (N, 1)
    sr = jnp.dot(h, a[0, F_out:].astype(f32).reshape(F_out, 1),
                 precision=hi).reshape(1, N)                            # (1, N)

    # --- lane-dense padding & 2-D tile sizes (perf review items 2/3/9) ----
    nbase = _round_up(N, 128)
    tm = min(tm, nbase)
    tn = min(tn, nbase)
    n_rows = _round_up(N, tm)
    n_cols = _round_up(N, tn)
    f_pad = _round_up(F_out, 128)

    sl_p = jnp.pad(sl, ((0, n_rows - N), (0, 0)))
    sr_p = jnp.pad(sr, ((0, 0), (0, n_cols - N)))
    mask_p = jnp.pad(adj_mask.astype(jnp.bfloat16),        # bf16 mask: fewer HBM bytes
                     ((0, n_rows - N), (0, n_cols - N)))
    h_p = jnp.pad(h, ((0, n_cols - N), (0, f_pad - F_out)))

    kernel = _make_kernel(float(alpha), act, f32)

    out = pl.pallas_call(
        kernel,
        out_shape=jax.ShapeDtypeStruct((n_rows, f_pad), f32),
        grid=(n_rows // tm, n_cols // tn),          # reduction (cols) last
        in_specs=[
            pl.BlockSpec((tm, 1), lambda i, j: (i, 0)),       # left scores
            pl.BlockSpec((1, tn), lambda i, j: (0, j)),       # right scores
            pl.BlockSpec((tm, tn), lambda i, j: (i, j)),      # adjacency mask tile
            pl.BlockSpec((tn, f_pad), lambda i, j: (j, 0)),   # neighbor features
        ],
        out_specs=pl.BlockSpec((tm, f_pad), lambda i, j: (i, 0)),
        scratch_shapes=[
            pltpu.VMEM((tm, f_pad), f32),   # aggregation accumulator
            pltpu.VMEM((tm, 1), f32),       # row-sum accumulator
        ],
        compiler_params=pltpu.CompilerParams(
            dimension_semantics=("parallel", "arbitrary"),
            vmem_limit_bytes=32 * 1024 * 1024,
        ),
    )(sl_p, sr_p, mask_p, h_p)

    return out[:N, :F_out]


def sp_graph_attention_ref(x, adj_mask, W, a, *, alpha=0.2, act=jax.nn.relu):
    """Pure-JAX dense reference for the sparse GAT forward."""
    hi = jax.lax.Precision.HIGHEST
    F_out = W.shape[1]
    h = jnp.dot(x, W, precision=hi)
    sl = jnp.dot(h, a[0, :F_out], precision=hi)
    sr = jnp.dot(h, a[0, F_out:], precision=hi)
    score = sl[:, None] + sr[None, :]
    e = jnp.exp(-jnp.where(score >= 0.0, score, alpha * score)) * adj_mask
    rowsum = jnp.sum(e, axis=1, keepdims=True)
    h_prime = jnp.dot(e, h, precision=hi) / rowsum
    return act(h_prime)


if __name__ == "__main__":
    N = 64            # number of graph nodes
    in_features = 32
    out_features = 64
    alpha = 0.2       # LeakyReLU negative slope

    key = jax.random.PRNGKey(0)
    kx, kadj, kw, ka = jax.random.split(key, 4)

    x = jax.random.normal(kx, (N, in_features), dtype=jnp.float32)

    # Dense 0/1 adjacency mask == sparsity pattern of the torch.sparse_coo adj.
    # Self-loops included so every row has at least one edge (rowsum > 0),
    # matching standard GAT usage and avoiding 0/0 in the reference too.
    adj_mask = (jax.random.uniform(kadj, (N, N)) > 0.7).astype(jnp.float32)
    adj_mask = jnp.maximum(adj_mask, jnp.eye(N, dtype=jnp.float32))

    # xavier_normal_(gain=1.414) style inits for W and a.
    std_w = 1.414 * (2.0 / (in_features + out_features)) ** 0.5
    W = std_w * jax.random.normal(kw, (in_features, out_features), dtype=jnp.float32)
    std_a = 1.414 * (2.0 / (1 + 2 * out_features)) ** 0.5
    a = std_a * jax.random.normal(ka, (1, 2 * out_features), dtype=jnp.float32)

    out = sp_graph_attention(x, adj_mask, W, a, alpha=alpha, act=jax.nn.relu)
    out = jax.block_until_ready(out)

    ref = sp_graph_attention_ref(x, adj_mask, W, a, alpha=alpha, act=jax.nn.relu)
    assert out.shape == (N, out_features)
    assert not bool(jnp.isnan(out).any())
    assert jnp.allclose(out, ref, atol=5e-3, rtol=5e-3), "mismatch vs reference"

    print("KERNEL_OK")
</pallas_src>

<mosaic_0001>
module attributes {stable_mosaic.version = 11 : i64} {
  func.func @kernel(%arg0: i32, %arg1: i32, %arg2: memref<128x1xf32, #tpu.memory_space<vmem>>, %arg3: memref<1x128xf32, #tpu.memory_space<vmem>>, %arg4: memref<128x128xbf16, #tpu.memory_space<vmem>>, %arg5: memref<128x128xf32, #tpu.memory_space<vmem>>, %arg6: memref<128x128xf32, #tpu.memory_space<vmem>>, %arg7: memref<128x128xf32, #tpu.memory_space<vmem>>, %arg8: memref<128x1xf32, #tpu.memory_space<vmem>>) attributes {dimension_semantics = [#tpu.dimension_semantics<parallel>, #tpu.dimension_semantics<arbitrary>], iteration_bounds = array<i64: 1, 1>, scalar_prefetch = 0 : i64, scratch_operands = 2 : i64, tpu.core_type = #tpu.core_type<tc>, window_params = [{transform_indices = @transform_0, window_bounds = array<i64: 128, 1>}, {transform_indices = @transform_1, window_bounds = array<i64: 1, 128>}, {transform_indices = @transform_2, window_bounds = array<i64: 128, 128>}, {transform_indices = @transform_3, window_bounds = array<i64: 128, 128>}, {transform_indices = @transform_4, window_bounds = array<i64: 128, 128>}]} {
    %c0_i32 = arith.constant 0 : i32
    %0 = arith.cmpi eq, %arg1, %c0_i32 : i32
    %1 = arith.extui %0 : i1 to i32
    %c0_i32_0 = arith.constant 0 : i32
    %2 = arith.cmpi ne, %1, %c0_i32_0 : i32
    scf.if %2 {
      %cst_22 = arith.constant 0.000000e+00 : f32
      %32 = vector.broadcast %cst_22 : f32 to vector<128x128xf32>
      %c0_23 = arith.constant 0 : index
      %c0_24 = arith.constant 0 : index
      %33 = vector.load %arg7[%c0_23, %c0_24] : memref<128x128xf32, #tpu.memory_space<vmem>>, vector<128x128xf32>
      tpu.vector_store %arg7[%c0_23, %c0_24], %32 {strides = array<i32>} : memref<128x128xf32, #tpu.memory_space<vmem>>, vector<128x128xf32>,
      %cst_25 = arith.constant 0.000000e+00 : f32
      %34 = vector.broadcast %cst_25 : f32 to vector<128x1xf32>
      %c0_26 = arith.constant 0 : index
      %c0_27 = arith.constant 0 : index
      %35 = vector.load %arg8[%c0_26, %c0_27] : memref<128x1xf32, #tpu.memory_space<vmem>>, vector<128x1xf32>
      tpu.vector_store %arg8[%c0_26, %c0_27], %34 {strides = array<i32>} : memref<128x1xf32, #tpu.memory_space<vmem>>, vector<128x1xf32>,
    } else {
    }
    %c0 = arith.constant 0 : index
    %c0_1 = arith.constant 0 : index
    %3 = vector.load %arg2[%c0, %c0_1] : memref<128x1xf32, #tpu.memory_space<vmem>>, vector<128x1xf32>
    %c0_2 = arith.constant 0 : index
    %c0_3 = arith.constant 0 : index
    %4 = vector.load %arg3[%c0_2, %c0_3] : memref<1x128xf32, #tpu.memory_space<vmem>>, vector<1x128xf32>
    %5 = vector.broadcast %3 : vector<128x1xf32> to vector<128x128xf32>
    %6 = vector.broadcast %4 : vector<1x128xf32> to vector<128x128xf32>
    %7 = arith.addf %5, %6 : vector<128x128xf32>
    %cst = arith.constant 0.000000e+00 : f32
    %8 = vector.broadcast %cst : f32 to vector<128x128xf32>
    %9 = arith.cmpf oge, %7, %8 : vector<128x128xf32>
    %cst_4 = arith.constant 2.000000e-01 : f32
    %10 = vector.broadcast %cst_4 : f32 to vector<128x128xf32>
    %11 = arith.mulf %10, %7 : vector<128x128xf32>
    %12 = arith.select %9, %7, %11 : vector<128x128xi1>, vector<128x128xf32>
    %cst_5 = arith.constant 0.000000e+00 : f32
    %13 = vector.broadcast %cst_5 : f32 to vector<128x128xf32>
    %14 = arith.subf %13, %12 : vector<128x128xf32>
    %15 = math.exp %14 : vector<128x128xf32>
    %c0_6 = arith.constant 0 : index
    %c0_7 = arith.constant 0 : index
    %16 = vector.load %arg4[%c0_6, %c0_7] : memref<128x128xbf16, #tpu.memory_space<vmem>>, vector<128x128xbf16>
    %17 = arith.extf %16 : vector<128x128xbf16> to vector<128x128xf32>
    %18 = arith.mulf %15, %17 : vector<128x128xf32>
    %c0_8 = arith.constant 0 : index
    %c0_9 = arith.constant 0 : index
    %19 = vector.load %arg8[%c0_8, %c0_9] : memref<128x1xf32, #tpu.memory_space<vmem>>, vector<128x1xf32>
    %cst_10 = arith.constant dense<0.000000e+00> : vector<128xf32>
    %20 = vector.multi_reduction <add>, %18, %cst_10 [1] : vector<128x128xf32> to vector<128xf32>
    %21 = vector.shape_cast %20 : vector<128xf32> to vector<128x1xf32>
    %22 = arith.addf %19, %21 : vector<128x1xf32>
    %c0_11 = arith.constant 0 : index
    %c0_12 = arith.constant 0 : index
    %23 = vector.load %arg8[%c0_11, %c0_12] : memref<128x1xf32, #tpu.memory_space<vmem>>, vector<128x1xf32>
    tpu.vector_store %arg8[%c0_11, %c0_12], %22 {strides = array<i32>} : memref<128x1xf32, #tpu.memory_space<vmem>>, vector<128x1xf32>,
    %c0_13 = arith.constant 0 : index
    %c0_14 = arith.constant 0 : index
    %24 = vector.load %arg7[%c0_13, %c0_14] : memref<128x128xf32, #tpu.memory_space<vmem>>, vector<128x128xf32>
    %c0_15 = arith.constant 0 : index
    %c0_16 = arith.constant 0 : index
    %25 = vector.load %arg5[%c0_15, %c0_16] : memref<128x128xf32, #tpu.memory_space<vmem>>, vector<128x128xf32>
    %cst_17 = arith.constant dense<0.000000e+00> : vector<128x128xf32>
    %26 = tpu.matmul %18, %25, %cst_17 {dimension_numbers = #tpu.dot_dimension_numbers<[1], [0], [0], [1], [0, 0, 1, 1], [], []>} : vector<128x128xf32>, vector<128x128xf32>, vector<128x128xf32> -> vector<128x128xf32>
    %27 = arith.addf %24, %26 : vector<128x128xf32>
    %c0_18 = arith.constant 0 : index
    %c0_19 = arith.constant 0 : index
    %28 = vector.load %arg7[%c0_18, %c0_19] : memref<128x128xf32, #tpu.memory_space<vmem>>, vector<128x128xf32>
    tpu.vector_store %arg7[%c0_18, %c0_19], %27 {strides = array<i32>} : memref<128x128xf32, #tpu.memory_space<vmem>>, vector<128x128xf32>,
    %c0_i32_20 = arith.constant 0 : i32
    %29 = arith.cmpi eq, %arg1, %c0_i32_20 : i32
    %30 = arith.extui %29 : i1 to i32
    %c0_i32_21 = arith.constant 0 : i32
    %31 = arith.cmpi ne, %30, %c0_i32_21 : i32
    scf.if %31 {
      %c0_22 = arith.constant 0 : index
      %c0_23 = arith.constant 0 : index
      %32 = vector.load %arg7[%c0_22, %c0_23] : memref<128x128xf32, #tpu.memory_space<vmem>>, vector<128x128xf32>
      %c0_24 = arith.constant 0 : index
      %c0_25 = arith.constant 0 : index
      %33 = vector.load %arg8[%c0_24, %c0_25] : memref<128x1xf32, #tpu.memory_space<vmem>>, vector<128x1xf32>
      %34 = vector.broadcast %33 : vector<128x1xf32> to vector<128x128xf32>
      %35 = arith.divf %32, %34 : vector<128x128xf32>
      %cst_26 = arith.constant 0.000000e+00 : f32
      %36 = vector.broadcast %cst_26 : f32 to vector<128x128xf32>
      %37 = arith.maximumf %35, %36 : vector<128x128xf32>
      %c0_27 = arith.constant 0 : index
      %c0_28 = arith.constant 0 : index
      %38 = vector.load %arg6[%c0_27, %c0_28] : memref<128x128xf32, #tpu.memory_space<vmem>>, vector<128x128xf32>
      tpu.vector_store %arg6[%c0_27, %c0_28], %37 {strides = array<i32>} : memref<128x128xf32, #tpu.memory_space<vmem>>, vector<128x128xf32>,
    } else {
    }
    return
  }
  func.func @transform_0(%arg0: i32, %arg1: i32) -> (i32, i32) {
    %c0_i32 = arith.constant 0 : i32
    %c0_i32_0 = arith.constant 0 : i32
    return %arg0, %c0_i32 : i32, i32
  }
  func.func @transform_1(%arg0: i32, %arg1: i32) -> (i32, i32) {
    %c0_i32 = arith.constant 0 : i32
    %c0_i32_0 = arith.constant 0 : i32
    return %c0_i32, %arg1 : i32, i32
  }
  func.func @transform_2(%arg0: i32, %arg1: i32) -> (i32, i32) {
    %c0_i32 = arith.constant 0 : i32
    return %arg0, %arg1 : i32, i32
  }
  func.func @transform_3(%arg0: i32, %arg1: i32) -> (i32, i32) {
    %c0_i32 = arith.constant 0 : i32
    %c0_i32_0 = arith.constant 0 : i32
    return %arg1, %c0_i32 : i32, i32
  }
  func.func @transform_4(%arg0: i32, %arg1: i32) -> (i32, i32) {
    %c0_i32 = arith.constant 0 : i32
    %c0_i32_0 = arith.constant 0 : i32
    return %arg0, %c0_i32 : i32, i32
  }
}

</mosaic_0001>

<bundles_post_ra>
// kernel: tpu_custom_call.1
= control target key start
LH: loop header
LB: loop body
LE: loop exit
PB: predicated region body
PF: predicated region fallthrough
CT: control target
= control target key end

     0   :  { %9 = vsyncpa [#allocation5], 0  ;;  %s1392_s0 = inlined_call_operand.vmem [shape: f32[128,1], index: 0, kind: input, shape index: {}]   ;;  %s1393_s1 = inlined_call_operand.vmem [shape: f32[1,128], index: 1, kind: input, shape index: {}]   ;;  %s1394_s2 = inlined_call_operand.hbm [shape: bf16[128,128], index: 2, kind: input, shape index: {}]   ;;  %s1395_s3 = inlined_call_operand.vmem [shape: f32[128,128], index: 3, kind: input, shape index: {}]   ;;  %s1396_s4 = inlined_call_operand.hbm [shape: f32[128,128], index: 4, kind: output, shape index: {}]  }
   0x1   :  { %10 = vsyncpa [#allocation6], 0  ;;  %s1116_s15 = smov [#allocation4]   ;;  %s1068_s19 = scalar_lea.hbm %s1394_s2, 1024 }
   0x2   :  { %s20_s16 = sshll.u32 %s1116_s15, 4  ;;  %p1069_p0 = scmp.ne.s32.totalorder %s1394_s2, %s1068_s19  ;;  %s21_s16 = int_to_ptr.vmem [resolvable:$true] %s20_s16 }
   0x3   :  { %p1072_p1 = scmp.lt.u32.totalorder %s1068_s19, %s1394_s2 }
   0x5   :  { %p1074_p2 = pnand %p1072_p1, %p1069_p0 }
   0x7   :  { %1077 = shalt.err (!%p1074_p2)
}
   0x8   :  { %s1078_s24 = scalar_lea.vmem %s21_s16, 1024  ;;  %p1083_p4 = scmp.lt.s32.totalorder %s21_s16, %s21_s16 }
   0x9   :  { %p1079_p3 = scmp.ne.s32.totalorder %s21_s16, %s1078_s24  ;;  %p1084_p5 = scmp.lt.s32.totalorder %s1078_s24, %s1078_s24 }
   0xb   :  { %p1085_p6 = por %p1084_p5, %p1083_p4 }
   0xd   :  { %p1086_p7 = pnand %p1085_p6, %p1079_p3 }
   0xf   :  { %1089 = shalt.err (!%p1086_p7)
}
  0x10   :  { %s1117_s25 = smov 64   ;;  %s1118_s26 = smov 4  }
  0x11   :  { %26 = dma.hbm_to_vmem [thread:$0]  %s1394_s2, 1024, %s21_s16, [#allocation5], %s1117_s25, %s1117_s25, %s1118_s26  }
  0x12   :  { %1112 = dma.done.wait [#allocation5], 1024  }
  0x13   :  { %1113 = vsyncadd [#allocation5], 4294966272  ;;  %v1119_v0 = vmov 0   ;;  %v70_v1 = vld [vmem:[%s1392_s0 + $0x8] sm:$0xff]  ;;  %v69_v2 = vld [vmem:[%s1392_s0] sm:$0xff]  ;;  %vm52_vm0 = vcmask 7168  }
  0x14   :  { %1003 = vset.pattern.permute.xlu1 %v1119_v0  ;;  %1002 = vset.pattern.permute.xlu0 %v1119_v0  ;;  %v78_v3 = vld [vmem:[%s1392_s0 + $0x48] sm:$0xff]  ;;  %v77_v4 = vld [vmem:[%s1392_s0 + $0x40] sm:$0xff]  ;;  %v79_v5 = vld [vmem:[%s1392_s0 + $0x50] sm:$0xff]  ;;  %v1120_v41 = vmov 0.0  }
  0x15   :  { %93 = vperm.xlu1 %1003, %v70_v1   ;;  %88 = vperm.xlu0 %1002, %v69_v2   ;;  %v429_v6 = vld [vmem:[%s1395_s3] sm:$0xff]  ;;  %v430_v7 = vld [vmem:[%s1395_s3 + $0x8] sm:$0xff]  ;;  %v71_v8 = vld [vmem:[%s1392_s0 + $0x10] sm:$0xff]  ;;  %54 = vst.msk [vmem:[#allocation3 + $0x8] sm:$0xff] %vm52_vm0, %v1120_v41 }
  0x16   :  { %v946_v9 = vpack.c.bf16 %v430_v7, %v429_v6  ;;  %v431_v10 = vld [vmem:[%s1395_s3 + $0x10] sm:$0xff]  ;;  %v432_v11 = vld [vmem:[%s1395_s3 + $0x18] sm:$0xff]  ;;  %v433_v13 = vld [vmem:[%s1395_s3 + $0x20] sm:$0xff]  ;;  %53 = vst.msk [vmem:[#allocation3] sm:$0xff] %vm52_vm0, %v1120_v41 }
  0x17   :  { %v950_v12 = vpack.c.bf16 %v432_v11, %v431_v10  ;;  %v434_v14 = vld [vmem:[%s1395_s3 + $0x28] sm:$0xff]  ;;  %v80_v15 = vld [vmem:[%s1392_s0 + $0x58] sm:$0xff]  ;;  %v435_v18 = vld [vmem:[%s1395_s3 + $0x30] sm:$0xff]  ;;  %55 = vst.msk [vmem:[#allocation3 + $0x10] sm:$0xff] %vm52_vm0, %v1120_v41 }
  0x18   :  { %947 = vmatprep.subr.bf16.mxu0 %v946_v9  ;;  %978 = vmatprep.subr.bf16.mxu1 %v946_v9  ;;  %v72_v16 = vld [vmem:[%s1392_s0 + $0x18] sm:$0xff]  ;;  %v954_v17 = vpack.c.bf16 %v434_v14, %v433_v13  ;;  %v81_v20 = vld [vmem:[%s1392_s0 + $0x60] sm:$0xff]  ;;  %v438_v24 = vld [vmem:[%s1395_s3 + $0x48] sm:$0xff]  ;;  %56 = vst.msk [vmem:[#allocation3 + $0x18] sm:$0xff] %vm52_vm0, %v1120_v41 }
  0x19   :  { %133 = vperm.xlu1 %1003, %v78_v3   ;;  %128 = vperm.xlu0 %1002, %v77_v4   ;;  %v436_v19 = vld [vmem:[%s1395_s3 + $0x38] sm:$0xff]  ;;  %v73_v21 = vld [vmem:[%s1392_s0 + $0x20] sm:$0xff]  ;;  %v82_v25 = vld [vmem:[%s1392_s0 + $0x68] sm:$0xff]  ;;  %57 = vst.msk [vmem:[#allocation3 + $0x20] sm:$0xff] %vm52_vm0, %v1120_v41 }
  0x1a   :  { %949 = vmatpush3.bf16.msra.mxu0 %v946_v9  ;;  %986 = vmatpush3.bf16.msra.mxu1 %v946_v9  ;;  %v958_v22 = vpack.c.bf16 %v436_v19, %v435_v18  ;;  %v437_v23 = vld [vmem:[%s1395_s3 + $0x40] sm:$0xff]  ;;  %v74_v26 = vld [vmem:[%s1392_s0 + $0x28] sm:$0xff]  ;;  %v439_v28 = vld [vmem:[%s1395_s3 + $0x50] sm:$0xff]  ;;  %58 = vst.msk [vmem:[#allocation3 + $0x28] sm:$0xff] %vm52_vm0, %v1120_v41 }
  0x1b   :  { %951 = vmatprep.subr.bf16.mxu0 %v950_v12  ;;  %979 = vmatprep.subr.bf16.mxu1 %v950_v12  ;;  %v962_v27 = vpack.c.bf16 %v438_v24, %v437_v23  ;;  %v440_v29 = vld [vmem:[%s1395_s3 + $0x58] sm:$0xff]  ;;  %v83_v30 = vld [vmem:[%s1392_s0 + $0x70] sm:$0xff]  ;;  %v441_v33 = vld [vmem:[%s1395_s3 + $0x60] sm:$0xff]  ;;  %59 = vst.msk [vmem:[#allocation3 + $0x30] sm:$0xff] %vm52_vm0, %v1120_v41 }
  0x1c   :  { %v75_v31 = vld [vmem:[%s1392_s0 + $0x30] sm:$0xff]  ;;  %v966_v32 = vpack.c.bf16 %v440_v29, %v439_v28  ;;  %v442_v34 = vld [vmem:[%s1395_s3 + $0x68] sm:$0xff]  ;;  %v84_v35 = vld [vmem:[%s1392_s0 + $0x78] sm:$0xff]  ;;  %60 = vst.msk [vmem:[#allocation3 + $0x38] sm:$0xff] %vm52_vm0, %v1120_v41 }
  0x1d   :  { %138 = vperm.xlu1 %1003, %v79_v5   ;;  %98 = vperm.xlu0 %1002, %v71_v8   ;;  %v76_v36 = vld [vmem:[%s1392_s0 + $0x38] sm:$0xff]  ;;  %v970_v37 = vpack.c.bf16 %v442_v34, %v441_v33  ;;  %v443_v38 = vld [vmem:[%s1395_s3 + $0x70] sm:$0xff]  ;;  %61 = vst.msk [vmem:[#allocation3 + $0x40] sm:$0xff] %vm52_vm0, %v1120_v41  ;;  %62 = vst.msk [vmem:[#allocation3 + $0x48] sm:$0xff] %vm52_vm0, %v1120_v41 }
  0x1e   :  { %953 = vmatpush3.bf16.msra.mxu0 %v950_v12  ;;  %987 = vmatpush3.bf16.msra.mxu1 %v950_v12  ;;  %v444_v39 = vld [vmem:[%s1395_s3 + $0x78] sm:$0xff]  ;;  %63 = vst.msk [vmem:[#allocation3 + $0x50] sm:$0xff] %vm52_vm0, %v1120_v41  ;;  %64 = vst.msk [vmem:[#allocation3 + $0x58] sm:$0xff] %vm52_vm0, %v1120_v41  ;;  %v1276_v42 = vld [vmem:[%s1393_s1] ss:$0 sm:$0xff]  ;;  %s1121_s1 = smov [#allocation7]  }
  0x1f   :  { %955 = vmatprep.subr.bf16.mxu0 %v954_v17  ;;  %980 = vmatprep.subr.bf16.mxu1 %v954_v17  ;;  %v974_v40 = vpack.c.bf16 %v444_v39, %v443_v38  ;;  %65 = vst.msk [vmem:[#allocation3 + $0x60] sm:$0xff] %vm52_vm0, %v1120_v41  ;;  %66 = vst.msk [vmem:[#allocation3 + $0x68] sm:$0xff] %vm52_vm0, %v1120_v41  ;;  %v1282_v55 = vld [vmem:[#allocation4] sm:$0xff]   ;;  %v1290_v7 = vld [vmem:[#allocation4 + $0x8] sm:$0xff]   ;;  %s806_s12 = sshll.u32 %s1121_s1, 4  ;;  %s807_s12 = int_to_ptr.vmem [resolvable:$true] %s806_s12 }
  0x20   :  { %67 = vst.msk [vmem:[#allocation3 + $0x70] sm:$0xff] %vm52_vm0, %v1120_v41  ;;  %68 = vst.msk [vmem:[#allocation3 + $0x78] sm:$0xff] %vm52_vm0, %v1120_v41  ;;  %v1284_v58 = vld [vmem:[#allocation4 + $0x20] sm:$0xff]   ;;  %v822_v1 = vunpack.c.h.bf16 %v1282_v55  ;;  %v821_v2 = vunpack.c.l.bf16 %v1282_v55  ;;  %v1293_v12 = vld [vmem:[#allocation4 + $0x28] sm:$0xff]   ;;  %v825_v18 = vunpack.c.l.bf16 %v1290_v7  ;;  %s1090_s13 = scalar_lea.vmem %s807_s12, 2048  ;;  %p1095_p9 = scmp.lt.s32.totalorder %s807_s12, %s807_s12 }
  0x21   :  { %143 = vperm.xlu1 %1003, %v80_v15   ;;  %103 = vperm.xlu0 %1002, %v72_v16   ;;  %v837_v10 = vunpack.c.l.bf16 %v1284_v58  ;;  %p1091_p8 = scmp.ne.s32.totalorder %s807_s12, %s1090_s13  ;;  %p1096_p10 = scmp.lt.s32.totalorder %s1090_s13, %s1090_s13 }
  0x22   :  { %957 = vmatpush3.bf16.msra.mxu0 %v954_v17  ;;  %988 = vmatpush3.bf16.msra.mxu1 %v954_v17 }
  0x23   :  { %959 = vmatprep.subr.bf16.mxu0 %v958_v22  ;;  %981 = vmatprep.subr.bf16.mxu1 %v958_v22  ;;  %p1097_p11 = por %p1096_p10, %p1095_p9 }
  0x25   :  { %148 = vperm.xlu1 %1003, %v81_v20   ;;  %108 = vperm.xlu0 %1002, %v73_v21   ;;  %p1098_p12 = pnand %p1097_p11, %p1091_p8 }
  0x26   :  { %961 = vmatpush3.bf16.msra.mxu0 %v958_v22  ;;  %989 = vmatpush3.bf16.msra.mxu1 %v958_v22  ;;  %v838_v22 = vunpack.c.h.bf16 %v1284_v58 }
  0x27   :  { %963 = vmatprep.subr.bf16.mxu0 %v962_v27  ;;  %982 = vmatprep.subr.bf16.mxu1 %v962_v27 }
  0x29   :  { %153 = vperm.xlu1 %1003, %v82_v25   ;;  %113 = vperm.xlu0 %1002, %v74_v26   ;;  %v841_v25 = vunpack.c.l.bf16 %v1293_v12 }
  0x2a   :  { %965 = vmatpush3.bf16.msra.mxu0 %v962_v27  ;;  %990 = vmatpush3.bf16.msra.mxu1 %v962_v27 }
  0x2b   :  { %967 = vmatprep.subr.bf16.mxu0 %v966_v32  ;;  %983 = vmatprep.subr.bf16.mxu1 %v966_v32 }
  0x2d   :  { %158 = vperm.xlu1 %1003, %v83_v30   ;;  %118 = vperm.xlu0 %1002, %v75_v31  }
  0x2e   :  { %969 = vmatpush3.bf16.msra.mxu0 %v966_v32  ;;  %991 = vmatpush3.bf16.msra.mxu1 %v966_v32  ;;  %v826_v32 = vunpack.c.h.bf16 %v1290_v7  ;;  %v853_v7 = vld [vmem:[#allocation4 + $0x18] sm:$0xff]  }
  0x2f   :  { %971 = vmatprep.subr.bf16.mxu0 %v970_v37  ;;  %984 = vmatprep.subr.bf16.mxu1 %v970_v37 }
  0x31   :  { %163 = vperm.xlu1 %1003, %v84_v35   ;;  %123 = vperm.xlu0 %1002, %v76_v36  }
  0x32   :  { %973 = vmatpush3.bf16.msra.mxu0 %v970_v37  ;;  %992 = vmatpush3.bf16.msra.mxu1 %v970_v37  ;;  %v1303_v37 = vld [vmem:[#allocation4 + $0x30] sm:$0xff]  }
  0x33   :  { %975 = vmatprep.subr.bf16.mxu0 %v974_v40  ;;  %985 = vmatprep.subr.bf16.mxu1 %v974_v40 }
  0x36   :  { %977 = vmatpush3.bf16.msra.mxu0 %v974_v40  ;;  %993 = vmatpush3.bf16.msra.mxu1 %v974_v40  ;;  %v842_v40 = vunpack.c.h.bf16 %v1293_v12 }
  0x94   :  { %v94_v43 = vpop.permute.xlu1 %93  ;;  %v89_v44 = vpop.permute.xlu0 %88 }
  0x95   :  { %v173_v45 = vadd.f32 %v1276_v42, %v94_v43  ;;  %v172_v46 = vadd.f32 %v1276_v42, %v89_v44 }
  0x97   :  { %vm189_vm1 = vcmp.ge.f32.partialorder %v173_v45, 0.0  ;;  %v205_v47 = vmul.f32 0.2, %v173_v45  ;;  %vm188_vm2 = vcmp.ge.f32.partialorder %v172_v46, 0.0  ;;  %v204_v48 = vmul.f32 0.2, %v172_v46 }
  0x98   :  { %v134_v49 = vpop.permute.xlu1 %133  ;;  %v129_v50 = vpop.permute.xlu0 %128 }
  0x99   :  { %v221_v51 = vsel %vm189_vm1, %v173_v45, %v205_v47  ;;  %v220_v52 = vsel %vm188_vm2, %v172_v46, %v204_v48  ;;  %v181_v53 = vadd.f32 %v1276_v42, %v134_v49  ;;  %v180_v54 = vadd.f32 %v1276_v42, %v129_v50 }
  0x9a   :  { %v237_v56 = vsub.f32 0.0, %v221_v51  ;;  %v236_v57 = vsub.f32 0.0, %v220_v52  ;;  %v845_v49 = vunpack.c.l.bf16 %v1303_v37 }
  0x9b   :  { %vm197_vm3 = vcmp.ge.f32.partialorder %v181_v53, 0.0  ;;  %v213_v59 = vmul.f32 0.2, %v181_v53  ;;  %vm196_vm4 = vcmp.ge.f32.partialorder %v180_v54, 0.0  ;;  %v212_v60 = vmul.f32 0.2, %v180_v54 }
  0x9c   :  { %v254_v61 = vmul.f32 1.442695, %v237_v56  ;;  %v252_v62 = vmul.f32 1.442695, %v236_v57  ;;  %v139_v63 = vpop.permute.xlu1 %138  ;;  %v99_v0 = vpop.permute.xlu0 %98 }
  0x9d   :  { %v229_v3 = vsel %vm197_vm3, %v181_v53, %v213_v59  ;;  %v228_v4 = vsel %vm196_vm4, %v180_v54, %v212_v60  ;;  %v182_v5 = vadd.f32 %v1276_v42, %v139_v63  ;;  %v174_v6 = vadd.f32 %v1276_v42, %v99_v0 }
  0x9e   :  { %1004 = vpow2.f32 %v254_v61  ;;  %v245_v8 = vsub.f32 0.0, %v229_v3  ;;  %v244_v9 = vsub.f32 0.0, %v228_v4 }
  0x9f   :  { %1006 = vpow2.f32 %v252_v62  ;;  %vm198_vm5 = vcmp.ge.f32.partialorder %v182_v5, 0.0  ;;  %v214_v11 = vmul.f32 0.2, %v182_v5  ;;  %vm190_vm6 = vcmp.ge.f32.partialorder %v174_v6, 0.0 }
  0xa0   :  { %v270_v13 = vmul.f32 1.442695, %v245_v8  ;;  %v268_v14 = vmul.f32 1.442695, %v244_v9  ;;  %v206_v15 = vmul.f32 0.2, %v174_v6  ;;  %v144_v16 = vpop.permute.xlu1 %143  ;;  %v104_v17 = vpop.permute.xlu0 %103 }
  0xa1   :  { %v230_v19 = vsel %vm198_vm5, %v182_v5, %v214_v11  ;;  %v183_v20 = vadd.f32 %v1276_v42, %v144_v16  ;;  %v175_v21 = vadd.f32 %v1276_v42, %v104_v17 }
  0xa2   :  { %1008 = vpow2.f32 %v270_v13  ;;  %v246_v23 = vsub.f32 0.0, %v230_v19  ;;  %v222_v24 = vsel %vm190_vm6, %v174_v6, %v206_v15 }
  0xa3   :  { %1010 = vpow2.f32 %v268_v14  ;;  %v238_v26 = vsub.f32 0.0, %v222_v24  ;;  %vm199_vm7 = vcmp.ge.f32.partialorder %v183_v20, 0.0  ;;  %v215_v27 = vmul.f32 0.2, %v183_v20 }
  0xa4   :  { %v272_v28 = vmul.f32 1.442695, %v246_v23  ;;  %vm191_vm8 = vcmp.ge.f32.partialorder %v175_v21, 0.0  ;;  %v207_v29 = vmul.f32 0.2, %v175_v21  ;;  %v149_v30 = vpop.permute.xlu1 %148  ;;  %v109_v31 = vpop.permute.xlu0 %108 }
  0xa5   :  { %v256_v33 = vmul.f32 1.442695, %v238_v26  ;;  %v231_v34 = vsel %vm199_vm7, %v183_v20, %v215_v27  ;;  %v184_v35 = vadd.f32 %v1276_v42, %v149_v30  ;;  %v176_v36 = vadd.f32 %v1276_v42, %v109_v31 }
  0xa6   :  { %1012 = vpow2.f32 %v272_v28  ;;  %v247_v38 = vsub.f32 0.0, %v231_v34  ;;  %v223_v39 = vsel %vm191_vm8, %v175_v21, %v207_v29 }
  0xa7   :  { %1014 = vpow2.f32 %v256_v33  ;;  %v239_v41 = vsub.f32 0.0, %v223_v39  ;;  %vm200_vm9 = vcmp.ge.f32.partialorder %v184_v35, 0.0  ;;  %v216_v43 = vmul.f32 0.2, %v184_v35  ;;  %v852_v33 = vld [vmem:[#allocation4 + $0x10] sm:$0xff]  }
  0xa8   :  { %v1005_v44 = vpop.eup %1004  ;;  %v274_v45 = vmul.f32 1.442695, %v247_v38  ;;  %vm192_vm10 = vcmp.ge.f32.partialorder %v176_v36, 0.0  ;;  %v208_v46 = vmul.f32 0.2, %v176_v36  ;;  %v154_v47 = vpop.permute.xlu1 %153 }
  0xa9   :  { %v114_v48 = vpop.permute.xlu0 %113  ;;  %v1007_v50 = vpop.eup %1006  ;;  %v258_v51 = vmul.f32 1.442695, %v239_v41  ;;  %v232_v52 = vsel %vm200_vm9, %v184_v35, %v216_v43  ;;  %v185_v53 = vadd.f32 %v1276_v42, %v154_v47  ;;  %v317_v59 = vmul.f32 %v1005_v44, %v822_v1 }
  0xaa   :  { %v177_v54 = vadd.f32 %v1276_v42, %v114_v48  ;;  %1016 = vpow2.f32 %v274_v45  ;;  %v248_v56 = vsub.f32 0.0, %v232_v52  ;;  %v224_v57 = vsel %vm192_vm10, %v176_v36, %v208_v46 }
  0xab   :  { %1018 = vpow2.f32 %v258_v51  ;;  %v240_v60 = vsub.f32 0.0, %v224_v57  ;;  %vm201_vm11 = vcmp.ge.f32.partialorder %v185_v53, 0.0  ;;  %v217_v61 = vmul.f32 0.2, %v185_v53  ;;  %350 = vadd.xlane.f32.xlu1 %v317_v59 }
  0xac   :  { %v1009_v62 = vpop.eup %1008  ;;  %v276_v63 = vmul.f32 1.442695, %v248_v56  ;;  %vm193_vm12 = vcmp.ge.f32.partialorder %v177_v54, 0.0  ;;  %v209_v0 = vmul.f32 0.2, %v177_v54  ;;  %v316_v3 = vmul.f32 %v1007_v50, %v821_v2  ;;  %v159_v4 = vpop.permute.xlu1 %158 }
  0xad   :  { %v119_v5 = vpop.permute.xlu0 %118  ;;  %v1011_v6 = vpop.eup %1010  ;;  %v260_v8 = vmul.f32 1.442695, %v240_v60  ;;  %v233_v9 = vsel %vm201_vm11, %v185_v53, %v217_v61  ;;  %v186_v11 = vadd.f32 %v1276_v42, %v159_v4  ;;  %v1322_v23 = vmul.f32 %v1009_v62, %v838_v22 }
  0xae   :  { %v178_v1 = vadd.f32 %v1276_v42, %v119_v5  ;;  %1020 = vpow2.f32 %v276_v63  ;;  %v249_v13 = vsub.f32 0.0, %v233_v9  ;;  %v225_v14 = vsel %vm193_vm12, %v177_v54, %v209_v0  ;;  %348 = vadd.xlane.f32.xlu0 %v316_v3  ;;  %922 = vmatprep.mubr.f32.mxu0 %v316_v3  ;;  %v857_v54 = vld [vmem:[#allocation4 + $0x38] sm:$0xff]   ;;  %v333_v9 = vld [vmem:[#allocation3 + $0x8] sm:$0xff] }
  0xaf   :  { %v1317_v15 = vmul.f32 %v1011_v6, %v837_v10  ;;  %1022 = vpow2.f32 %v260_v8  ;;  %v241_v55 = vsub.f32 0.0, %v225_v14  ;;  %vm202_vm13 = vcmp.ge.f32.partialorder %v186_v11, 0.0  ;;  %923 = vmatmul.mubr.f32.vlgmr.msra.gmra.mrb[0].mxu0 %v317_v59 }
  0xb0   :  { %v218_v2 = vmul.f32 0.2, %v186_v11  ;;  %v1013_v16 = vpop.eup %1012  ;;  %v278_v17 = vmul.f32 1.442695, %v249_v13  ;;  %vm194_vm14 = vcmp.ge.f32.partialorder %v178_v1, 0.0  ;;  %v164_v20 = vpop.permute.xlu1 %163  ;;  %v829_v43 = vunpack.c.l.bf16 %v852_v33 }
  0xb1   :  { %v210_v19 = vmul.f32 0.2, %v178_v1  ;;  %934 = vmatprep.mubr.f32.mxu1 %v1317_v15  ;;  %v124_v21 = vpop.permute.xlu0 %123  ;;  %v1015_v24 = vpop.eup %1014  ;;  %v262_v10 = vmul.f32 1.442695, %v241_v55  ;;  %v187_v27 = vadd.f32 %v1276_v42, %v164_v20  ;;  %v830_v53 = vunpack.c.h.bf16 %v852_v33  ;;  %v338_v33 = vld [vmem:[#allocation3 + $0x30] sm:$0xff] }
  0xb2   :  { %v234_v26 = vsel %vm202_vm13, %v186_v11, %v218_v2  ;;  %v179_v28 = vadd.f32 %v1276_v42, %v124_v21  ;;  %1024 = vpow2.f32 %v278_v17  ;;  %v318_v31 = vmul.f32 %v1015_v24, %v825_v18  ;;  %935 = vmatmul.mubr.f32.vlgmr.msra.gmra.mrb[0].mxu1 %v1322_v23  ;;  %v336_v24 = vld [vmem:[#allocation3 + $0x20] sm:$0xff] }
  0xb3   :  { %v250_v29 = vsub.f32 0.0, %v234_v26  ;;  %v226_v30 = vsel %vm194_vm14, %v178_v1, %v210_v19  ;;  %1026 = vpow2.f32 %v262_v10  ;;  %vm203_vm15 = vcmp.ge.f32.partialorder %v187_v27, 0.0  ;;  %v332_v1 = vld [vmem:[#allocation3] sm:$0xff]  ;;  %v335_v19 = vld [vmem:[#allocation3 + $0x18] sm:$0xff] }
  0xb4   :  { %v242_v58 = vsub.f32 0.0, %v226_v30  ;;  %v219_v22 = vmul.f32 0.2, %v187_v27  ;;  %v1017_v34 = vpop.eup %1016  ;;  %vm195_vm1 = vcmp.ge.f32.partialorder %v179_v28, 0.0  ;;  %v211_v36 = vmul.f32 0.2, %v179_v28  ;;  %352 = vadd.xlane.f32.xlu0 %v318_v31  ;;  %925 = vmatprep.mubr.f32.mxu0 %v318_v31 }
  0xb5   :  { %v280_v35 = vmul.f32 1.442695, %v250_v29  ;;  %v326_v42 = vmul.f32 %v1013_v16, %v841_v25  ;;  %v1019_v38 = vpop.eup %1018  ;;  %v327_v18 = vmul.f32 %v1017_v34, %v842_v40  ;;  %v846_v40 = vunpack.c.h.bf16 %v1303_v37 }
  0xb6   :  { %v264_v39 = vmul.f32 1.442695, %v242_v58  ;;  %v235_v41 = vsel %vm203_vm15, %v187_v27, %v219_v22  ;;  %v227_v45 = vsel %vm195_vm1, %v179_v28, %v211_v36  ;;  %v319_v46 = vmul.f32 %v1019_v38, %v826_v32  ;;  %v337_v28 = vld [vmem:[#allocation3 + $0x28] sm:$0xff]  ;;  %v339_v36 = vld [vmem:[#allocation3 + $0x38] sm:$0xff] }
  0xb7   :  { %1028 = vpow2.f32 %v280_v35  ;;  %v251_v44 = vsub.f32 0.0, %v235_v41  ;;  %937 = vmatprep.mubr.f32.mxu1 %v326_v42  ;;  %v243_v47 = vsub.f32 0.0, %v227_v45  ;;  %v849_v59 = vunpack.c.l.bf16 %v857_v54  ;;  %v340_v35 = vld [vmem:[#allocation3 + $0x40] sm:$0xff] }
  0xb8   :  { %1030 = vpow2.f32 %v264_v39  ;;  %938 = vmatmul.mubr.f32.gmra.mrb[2].mxu1 %v327_v18  ;;  %v1021_v48 = vpop.eup %1020  ;;  %354 = vadd.xlane.f32.xlu0 %v319_v46  ;;  %v833_v61 = vunpack.c.l.bf16 %v853_v7  ;;  %v850_v63 = vunpack.c.h.bf16 %v857_v54  ;;  %v834_v3 = vunpack.c.h.bf16 %v853_v7  ;;  %v346_v54 = vld [vmem:[#allocation3 + $0x70] sm:$0xff] }
  0xb9   :  { %v282_v50 = vmul.f32 1.442695, %v251_v44  ;;  %926 = vmatmul.mubr.f32.gmra.mrb[2].mxu0 %v319_v46  ;;  %v1023_v25 = vpop.eup %1022  ;;  %v266_v51 = vmul.f32 1.442695, %v243_v47  ;;  %v328_v12 = vmul.f32 %v1021_v48, %v845_v49  ;;  %v341_v44 = vld [vmem:[#allocation3 + $0x48] sm:$0xff] }
  0xba   :  { %v320_v52 = vmul.f32 %v1023_v25, %v829_v43  ;;  %v342_v43 = vld [vmem:[#allocation3 + $0x50] sm:$0xff]  ;;  %v344_v25 = vld [vmem:[#allocation3 + $0x60] sm:$0xff] }
  0xbb   :  { %1032 = vpow2.f32 %v282_v50  ;;  %940 = vmatprep.mubr.f32.mxu1 %v328_v12 }
  0xbc   :  { %1034 = vpow2.f32 %v266_v51  ;;  %v1025_v32 = vpop.eup %1024  ;;  %356 = vadd.xlane.f32.xlu1 %v320_v52  ;;  %928 = vmatprep.mubr.f32.mxu0 %v320_v52  ;;  %v343_v51 = vld [vmem:[#allocation3 + $0x58] sm:$0xff] }
  0xbd   :  { %v1027_v56 = vpop.eup %1026  ;;  %v329_v57 = vmul.f32 %v1025_v32, %v846_v40 }
  0xbe   :  { %v321_v60 = vmul.f32 %v1027_v56, %v830_v53  ;;  %v345_v56 = vld [vmem:[#allocation3 + $0x68] sm:$0xff] }
  0xbf   :  { %941 = vmatmul.mubr.f32.gmra.mrb[4].mxu1 %v329_v57 }
  0xc0   :  { %358 = vadd.xlane.f32.xlu0 %v321_v60  ;;  %929 = vmatmul.mubr.f32.gmra.mrb[4].mxu0 %v321_v60 }
  0xc1   :  { %v1029_v62 = vpop.eup %1028 }
  0xc2   :  { %v1031_v37 = vpop.eup %1030  ;;  %v330_v49 = vmul.f32 %v1029_v62, %v849_v59 }
  0xc3   :  { %v322_v0 = vmul.f32 %v1031_v37, %v833_v61 }
  0xc4   :  { %943 = vmatprep.mubr.f32.mxu1 %v330_v49 }
  0xc5   :  { %v1033_v4 = vpop.eup %1032  ;;  %360 = vadd.xlane.f32.xlu1 %v322_v0  ;;  %931 = vmatprep.mubr.f32.mxu0 %v322_v0 }
  0xc6   :  { %v1035_v5 = vpop.eup %1034  ;;  %v331_v6 = vmul.f32 %v1033_v4, %v850_v63 }
  0xc7   :  { %v323_v8 = vmul.f32 %v1035_v5, %v834_v3 }
  0xc8   :  { %944 = vmatmul.mubr.f32.gmra.mrb[6].mxu1 %v331_v6 }
  0xc9   :  { %364 = vadd.xlane.f32.xlu1 %v1317_v15  ;;  %362 = vadd.xlane.f32.xlu0 %v323_v8  ;;  %v334_v15 = vld [vmem:[#allocation3 + $0x10] sm:$0xff] }
  0xca   :  { %932 = vmatmul.mubr.f32.gmra.mrb[6].mxu0 %v323_v8 }
  0xcd   :  { %368 = vadd.xlane.f32.xlu1 %v326_v42  ;;  %366 = vadd.xlane.f32.xlu0 %v1322_v23 }
  0xd1   :  { %372 = vadd.xlane.f32.xlu1 %v328_v12  ;;  %370 = vadd.xlane.f32.xlu0 %v327_v18 }
  0xd5   :  { %376 = vadd.xlane.f32.xlu1 %v330_v49  ;;  %374 = vadd.xlane.f32.xlu0 %v329_v57  ;;  %v347_v49 = vld [vmem:[#allocation3 + $0x78] sm:$0xff] }
  0xd9   :  { %378 = vadd.xlane.f32.xlu0 %v331_v6 }
 0x138   :  { %v351_v11 = vpop.xlane.xlu1 %350 }
 0x139   :  { %v381_v13 = vadd.f32 %v351_v11, %v333_v9 }
 0x13b   :  { %v349_v14 = vpop.xlane.xlu0 %348  ;;  %398 = vst.msk [vmem:[#allocation3 + $0x8] sm:$0xff] %vm52_vm0, %v381_v13 }
 0x13c   :  { %v380_v55 = vadd.f32 %v349_v14, %v332_v1 }
 0x13e   :  { %397 = vst.msk [vmem:[#allocation3] sm:$0xff] %vm52_vm0, %v380_v55 }
 0x141   :  { %v353_v2 = vpop.xlane.xlu0 %352 }
 0x142   :  { %v382_v16 = vadd.f32 %v353_v2, %v334_v15  ;;  %v642_v17 = vld [vmem:[#allocation3 + $0x8] sm:$0xff] }
 0x143   :  { %664 = vperm.xlu0 %1002, %v642_v17  }
 0x144   :  { %399 = vst.msk [vmem:[#allocation3 + $0x10] sm:$0xff] %vm52_vm0, %v382_v16 }
 0x145   :  { %v641_v20 = vld [vmem:[#allocation3] sm:$0xff]  ;;  %v355_v21 = vpop.xlane.xlu0 %354 }
 0x146   :  { %659 = vperm.xlu1 %1003, %v641_v20   ;;  %v383_v23 = vadd.f32 %v355_v21, %v335_v19 }
 0x148   :  { %400 = vst.msk [vmem:[#allocation3 + $0x18] sm:$0xff] %vm52_vm0, %v383_v23 }
 0x149   :  { %v357_v10 = vpop.xlane.xlu1 %356 }
 0x14a   :  { %v384_v26 = vadd.f32 %v357_v10, %v336_v24 }
 0x14b   :  { %v643_v27 = vld [vmem:[#allocation3 + $0x10] sm:$0xff] }
 0x14c   :  { %401 = vst.msk [vmem:[#allocation3 + $0x20] sm:$0xff] %vm52_vm0, %v384_v26  ;;  %669 = vperm.xlu1 %1003, %v643_v27  }
 0x14d   :  { %v359_v29 = vpop.xlane.xlu0 %358 }
 0x14e   :  { %v385_v30 = vadd.f32 %v359_v29, %v337_v28 }
 0x14f   :  { %v644_v31 = vld [vmem:[#allocation3 + $0x18] sm:$0xff] }
 0x150   :  { %402 = vst.msk [vmem:[#allocation3 + $0x28] sm:$0xff] %vm52_vm0, %v385_v30  ;;  %674 = vperm.xlu1 %1003, %v644_v31  }
 0x152   :  { %v361_v58 = vpop.xlane.xlu1 %360 }
 0x153   :  { %v386_v22 = vadd.f32 %v361_v58, %v338_v33  ;;  %v645_v34 = vld [vmem:[#allocation3 + $0x20] sm:$0xff] }
 0x154   :  { %679 = vperm.xlu0 %1002, %v645_v34  }
 0x155   :  { %403 = vst.msk [vmem:[#allocation3 + $0x30] sm:$0xff] %vm52_vm0, %v386_v22 }
 0x156   :  { %v365_v42 = vpop.xlane.xlu1 %364  ;;  %v363_v38 = vpop.xlane.xlu0 %362 }
 0x157   :  { %v388_v39 = vadd.f32 %v365_v42, %v340_v35  ;;  %v387_v41 = vadd.f32 %v363_v38, %v339_v36  ;;  %v646_v18 = vld [vmem:[#allocation3 + $0x28] sm:$0xff] }
 0x158   :  { %684 = vperm.xlu1 %1003, %v646_v18  }
 0x159   :  { %405 = vst.msk [vmem:[#allocation3 + $0x40] sm:$0xff] %vm52_vm0, %v388_v39  ;;  %404 = vst.msk [vmem:[#allocation3 + $0x38] sm:$0xff] %vm52_vm0, %v387_v41 }
 0x15a   :  { %v369_v45 = vpop.xlane.xlu1 %368  ;;  %v367_v46 = vpop.xlane.xlu0 %366 }
 0x15b   :  { %v390_v47 = vadd.f32 %v369_v45, %v342_v43  ;;  %v389_v48 = vadd.f32 %v367_v46, %v341_v44 }
 0x15c   :  { %v647_v50 = vld [vmem:[#allocation3 + $0x30] sm:$0xff] }
 0x15d   :  { %407 = vst.msk [vmem:[#allocation3 + $0x50] sm:$0xff] %vm52_vm0, %v390_v47  ;;  %406 = vst.msk [vmem:[#allocation3 + $0x48] sm:$0xff] %vm52_vm0, %v389_v48  ;;  %689 = vperm.xlu0 %1002, %v647_v50  }
 0x15e   :  { %v373_v12 = vpop.xlane.xlu1 %372  ;;  %v371_v40 = vpop.xlane.xlu0 %370 }
 0x15f   :  { %v392_v52 = vadd.f32 %v373_v12, %v344_v25  ;;  %v391_v53 = vadd.f32 %v371_v40, %v343_v51 }
 0x160   :  { %v649_v7 = vld [vmem:[#allocation3 + $0x40] sm:$0xff]  ;;  %v648_v32 = vld [vmem:[#allocation3 + $0x38] sm:$0xff] }
 0x161   :  { %409 = vst.msk [vmem:[#allocation3 + $0x60] sm:$0xff] %vm52_vm0, %v392_v52  ;;  %408 = vst.msk [vmem:[#allocation3 + $0x58] sm:$0xff] %vm52_vm0, %v391_v53  ;;  %699 = vperm.xlu0 %1002, %v649_v7   ;;  %694 = vperm.xlu1 %1003, %v648_v32  }
 0x162   :  { %v377_v57 = vpop.xlane.xlu1 %376  ;;  %v375_v59 = vpop.xlane.xlu0 %374 }
 0x163   :  { %v394_v60 = vadd.f32 %v377_v57, %v346_v54  ;;  %v393_v61 = vadd.f32 %v375_v59, %v345_v56 }
 0x164   :  { %v651_v62 = vld [vmem:[#allocation3 + $0x50] sm:$0xff]  ;;  %v650_v37 = vld [vmem:[#allocation3 + $0x48] sm:$0xff] }
 0x165   :  { %411 = vst.msk [vmem:[#allocation3 + $0x70] sm:$0xff] %vm52_vm0, %v394_v60  ;;  %410 = vst.msk [vmem:[#allocation3 + $0x68] sm:$0xff] %vm52_vm0, %v393_v61  ;;  %709 = vperm.xlu0 %1002, %v651_v62   ;;  %704 = vperm.xlu1 %1003, %v650_v37  }
 0x166   :  { %v379_v63 = vpop.xlane.xlu0 %378 }
 0x167   :  { %v395_v0 = vadd.f32 %v379_v63, %v347_v49 }
 0x168   :  { %v653_v3 = vld [vmem:[#allocation3 + $0x60] sm:$0xff]  ;;  %v652_v4 = vld [vmem:[#allocation3 + $0x58] sm:$0xff] }
 0x169   :  { %412 = vst.msk [vmem:[#allocation3 + $0x78] sm:$0xff] %vm52_vm0, %v395_v0  ;;  %719 = vperm.xlu0 %1002, %v653_v3   ;;  %714 = vperm.xlu1 %1003, %v652_v4  }
 0x16c   :  { %v655_v5 = vld [vmem:[#allocation3 + $0x70] sm:$0xff]  ;;  %v654_v6 = vld [vmem:[#allocation3 + $0x68] sm:$0xff] }
 0x16d   :  { %729 = vperm.xlu0 %1002, %v655_v5   ;;  %724 = vperm.xlu1 %1003, %v654_v6  }
 0x170   :  { %v656_v8 = vld [vmem:[#allocation3 + $0x78] sm:$0xff] }
 0x171   :  { %734 = vperm.xlu1 %1003, %v656_v8  }
 0x182   :  { %v924_v9 = vpop.f32.mrb[0].mxu0 }
 0x183   :  { %v511_v11 = vpop.f32.mrb[1].mxu0 }
 0x185   :  { %v1356_v1 = vpop.f32.mrb[0].mxu1 }
 0x186   :  { %v1358_v13 = vpop.f32.mrb[1].mxu1 }
 0x18b   :  { %v1360_v14 = vpop.f32.mrb[2].mxu1 }
 0x18c   :  { %v927_v55 = vpop.f32.mrb[2].mxu0  ;;  %v1362_v15 = vpop.f32.mrb[3].mxu1 }
 0x18d   :  { %v521_v2 = vpop.f32.mrb[3].mxu0 }
 0x192   :  { %v1364_v16 = vpop.f32.mrb[4].mxu1 }
 0x193   :  { %v930_v17 = vpop.f32.mrb[4].mxu0  ;;  %v1366_v19 = vpop.f32.mrb[5].mxu1 }
 0x194   :  { %v531_v20 = vpop.f32.mrb[5].mxu0 }
 0x19b   :  { %v1368_v21 = vpop.f32.mrb[6].mxu1 }
 0x19c   :  { %v1370_v23 = vpop.f32.mrb[7].mxu1 }
 0x19d   :  { %v933_v24 = vpop.f32.mrb[6].mxu0 }
 0x19e   :  { %v541_v10 = vpop.f32.mrb[7].mxu0 }
 0x1c2   :  { %v665_v26 = vpop.permute.xlu0 %664 }
 0x1c3   :  { %1036 = vrcp.f32 %v665_v26 }
 0x1c5   :  { %v660_v27 = vpop.permute.xlu1 %659 }
 0x1c6   :  { %1038 = vrcp.f32 %v660_v27 }
 0x1cb   :  { %v670_v28 = vpop.permute.xlu1 %669 }
 0x1cc   :  { %1040 = vrcp.f32 %v670_v28 }
 0x1cd   :  { %v1037_v29 = vpop.eup %1036 }
 0x1ce   :  { %v740_v30 = vmul.f32 %v1037_v29, %v924_v9 }
 0x1cf   :  { %v675_v31 = vpop.permute.xlu1 %674 }
 0x1d0   :  { %v1039_v33 = vpop.eup %1038  ;;  %1042 = vrcp.f32 %v675_v31  ;;  %v770_v58 = vmax.f32 %v740_v30, 0.0 }
 0x1d1   :  { %v738_v22 = vmul.f32 %v1039_v33, %v511_v11 }
 0x1d2   :  { %786 = vst [vmem:[#allocation7 + $0x8] sm:$0xff] %v770_v58 }
 0x1d3   :  { %v769_v34 = vmax.f32 %v738_v22, 0.0  ;;  %v680_v35 = vpop.permute.xlu0 %679 }
 0x1d4   :  { %1044 = vrcp.f32 %v680_v35 }
 0x1d5   :  { %785 = vst [vmem:[#allocation7] sm:$0xff] %v769_v34 }
 0x1d6   :  { %v1041_v36 = vpop.eup %1040 }
 0x1d7   :  { %v742_v42 = vmul.f32 %v1041_v36, %v521_v2  ;;  %v685_v38 = vpop.permute.xlu1 %684 }
 0x1d8   :  { %1046 = vrcp.f32 %v685_v38 }
 0x1d9   :  { %v771_v39 = vmax.f32 %v742_v42, 0.0 }
 0x1da   :  { %v1043_v41 = vpop.eup %1042 }
 0x1db   :  { %787 = vst [vmem:[#allocation7 + $0x10] sm:$0xff] %v771_v39  ;;  %v744_v18 = vmul.f32 %v1043_v41, %v927_v55 }
 0x1dc   :  { %v690_v43 = vpop.permute.xlu0 %689 }
 0x1dd   :  { %1048 = vrcp.f32 %v690_v43  ;;  %v772_v44 = vmax.f32 %v744_v18, 0.0 }
 0x1de   :  { %v1045_v45 = vpop.eup %1044 }
 0x1df   :  { %788 = vst [vmem:[#allocation7 + $0x18] sm:$0xff] %v772_v44  ;;  %v746_v46 = vmul.f32 %v1045_v45, %v531_v20 }
 0x1e0   :  { %v700_v47 = vpop.permute.xlu0 %699  ;;  %v695_v48 = vpop.permute.xlu1 %694 }
 0x1e1   :  { %1050 = vrcp.f32 %v700_v47  ;;  %v773_v50 = vmax.f32 %v746_v46, 0.0 }
 0x1e2   :  { %1052 = vrcp.f32 %v695_v48  ;;  %v1047_v25 = vpop.eup %1046 }
 0x1e3   :  { %789 = vst [vmem:[#allocation7 + $0x20] sm:$0xff] %v773_v50  ;;  %v748_v51 = vmul.f32 %v1047_v25, %v930_v17 }
 0x1e4   :  { %v710_v12 = vpop.permute.xlu0 %709  ;;  %v705_v40 = vpop.permute.xlu1 %704 }
 0x1e5   :  { %1054 = vrcp.f32 %v710_v12  ;;  %v774_v52 = vmax.f32 %v748_v51, 0.0 }
 0x1e6   :  { %1056 = vrcp.f32 %v705_v40 }
 0x1e7   :  { %v1049_v53 = vpop.eup %1048  ;;  %790 = vst [vmem:[#allocation7 + $0x28] sm:$0xff] %v774_v52 }
 0x1e8   :  { %v750_v54 = vmul.f32 %v1049_v53, %v541_v10  ;;  %v720_v7 = vpop.permute.xlu0 %719  ;;  %v715_v32 = vpop.permute.xlu1 %714 }
 0x1e9   :  { %1058 = vrcp.f32 %v720_v7 }
 0x1ea   :  { %v775_v56 = vmax.f32 %v750_v54, 0.0  ;;  %1060 = vrcp.f32 %v715_v32 }
 0x1eb   :  { %v1051_v57 = vpop.eup %1050 }
 0x1ec   :  { %v1053_v59 = vpop.eup %1052  ;;  %791 = vst [vmem:[#allocation7 + $0x30] sm:$0xff] %v775_v56  ;;  %v754_v60 = vmul.f32 %v1051_v57, %v1358_v13  ;;  %v730_v61 = vpop.permute.xlu0 %729 }
 0x1ed   :  { %v725_v62 = vpop.permute.xlu1 %724  ;;  %v752_v37 = vmul.f32 %v1053_v59, %v933_v24  ;;  %1062 = vrcp.f32 %v730_v61 }
 0x1ee   :  { %v777_v49 = vmax.f32 %v754_v60, 0.0  ;;  %1064 = vrcp.f32 %v725_v62 }
 0x1ef   :  { %v1055_v63 = vpop.eup %1054  ;;  %v776_v0 = vmax.f32 %v752_v37, 0.0 }
 0x1f0   :  { %v1057_v3 = vpop.eup %1056  ;;  %793 = vst [vmem:[#allocation7 + $0x40] sm:$0xff] %v777_v49  ;;  %v758_v4 = vmul.f32 %v1055_v63, %v1362_v15 }
 0x1f1   :  { %v735_v5 = vpop.permute.xlu1 %734  ;;  %792 = vst [vmem:[#allocation7 + $0x38] sm:$0xff] %v776_v0  ;;  %v756_v6 = vmul.f32 %v1057_v3, %v1356_v1 }
 0x1f2   :  { %1066 = vrcp.f32 %v735_v5  ;;  %v779_v8 = vmax.f32 %v758_v4, 0.0 }
 0x1f3   :  { %v1059_v9 = vpop.eup %1058  ;;  %v778_v11 = vmax.f32 %v756_v6, 0.0 }
 0x1f4   :  { %v1061_v13 = vpop.eup %1060  ;;  %795 = vst [vmem:[#allocation7 + $0x50] sm:$0xff] %v779_v8  ;;  %v762_v55 = vmul.f32 %v1059_v9, %v1366_v19 }
 0x1f5   :  { %794 = vst [vmem:[#allocation7 + $0x48] sm:$0xff] %v778_v11  ;;  %v760_v2 = vmul.f32 %v1061_v13, %v1360_v14 }
 0x1f6   :  { %v781_v17 = vmax.f32 %v762_v55, 0.0 }
 0x1f7   :  { %v1063_v20 = vpop.eup %1062  ;;  %v780_v24 = vmax.f32 %v760_v2, 0.0 }
 0x1f8   :  { %v1065_v10 = vpop.eup %1064  ;;  %797 = vst [vmem:[#allocation7 + $0x60] sm:$0xff] %v781_v17  ;;  %v766_v15 = vmul.f32 %v1063_v20, %v1370_v23 }
 0x1f9   :  { %796 = vst [vmem:[#allocation7 + $0x58] sm:$0xff] %v780_v24  ;;  %v764_v1 = vmul.f32 %v1065_v10, %v1364_v16 }
 0x1fa   :  { %v783_v26 = vmax.f32 %v766_v15, 0.0 }
 0x1fb   :  { %v782_v28 = vmax.f32 %v764_v1, 0.0 }
 0x1fc   :  { %v1067_v27 = vpop.eup %1066  ;;  %799 = vst [vmem:[#allocation7 + $0x70] sm:$0xff] %v783_v26 }
 0x1fd   :  { %v768_v19 = vmul.f32 %v1067_v27, %v1368_v21  ;;  %798 = vst [vmem:[#allocation7 + $0x68] sm:$0xff] %v782_v28 }
 0x1ff   :  { %v784_v14 = vmax.f32 %v768_v19, 0.0 }
 0x201   :  { %800 = vst [vmem:[#allocation7 + $0x78] sm:$0xff] %v784_v14 }
 0x202   :  { %1101 = shalt.err (!%p1098_p12)
}
 0x203   :  { %s1102_s16 = scalar_lea.hbm %s1396_s4, 2048 }
 0x204   :  { %p1103_p13 = scmp.ne.s32.totalorder %s1396_s4, %s1102_s16  ;;  %p1106_p0 = scmp.lt.u32.totalorder %s1102_s16, %s1396_s4 }
 0x206   :  { %p1108_p1 = pnand %p1106_p0, %p1103_p13 }
 0x208   :  { %1111 = shalt.err (!%p1108_p1)
}
 0x209   :  { %s1122_s21 = smov 128   ;;  %s1123_s22 = smov 8  }
 0x20a   :  { %812 = dma.vmem_to_hbm [thread:$0]  %s807_s12, 2048, %s1396_s4, [#allocation6], %s1122_s21, %s1122_s21, %s1123_s22  }
 0x20b   :  { %1114 = dma.done.wait [#allocation6], 2048  }
 0x20c   :  { %1115 = vsyncadd [#allocation6], 4294965248 }
 0x20d   :  { %816 = vsyncpa [#allocation5], 1 }
 0x20e   :  { %817 = vsyncpa [#allocation6], 1 }

</bundles_post_ra>
